<compile_context>
chip_gen: v5e
topology: v5e:2x2
jax: 0.10.0
libtpu: 0.0.40
codegen_flags: <defaults>
</compile_context>

<pallas_src>
import functools
import math

import jax
import jax.numpy as jnp
from jax.experimental import pallas as pl
from jax.experimental.pallas import tpu as pltpu


# Projected K+V for one batch element must fit comfortably in VMEM for the
# resident-KV path (together with weights, score tiles and double-buffered
# q/out blocks).  8 MiB keeps the total inside v7x's 64 MiB VMEM and v5e's
# default scoped limit; longer sequences fall back to streaming K/V tiles.
_KV_RESIDENT_BYTES = 8 * 1024 * 1024

_SINGLE_BUFFER_OK = None  # cached feature probe for pipeline_mode=pl.Buffered(1)


def _probe_kernel(x_ref, o_ref):
    o_ref[...] = x_ref[...] + 1.0


def _single_buffer_supported():
    """True iff this jax build accepts pl.Buffered(1) on a pallas_call BlockSpec.

    Grid-constant operands (weights/biases) are only DMA'd once regardless, but
    single-buffering them halves their VMEM reservation (important at D>=768 on
    v5e / v7x).  Builds without the feature fall back to default buffering.
    """
    global _SINGLE_BUFFER_OK
    if _SINGLE_BUFFER_OK is not None:
        return _SINGLE_BUFFER_OK
    try:
        spec = pl.BlockSpec((8, 128), lambda i: (0, 0),
                            pipeline_mode=pl.Buffered(1))
        out = pl.pallas_call(
            _probe_kernel,
            out_shape=jax.ShapeDtypeStruct((8, 128), jnp.float32),
            grid=(2,),
            in_specs=[spec],
            out_specs=pl.BlockSpec((8, 128), lambda i: (0, 0)),
        )(jnp.zeros((8, 128), jnp.float32))
        jax.block_until_ready(out)
        _SINGLE_BUFFER_OK = True
    except Exception:  # any failure => use default (double) buffering
        _SINGLE_BUFFER_OK = False
    return _SINGLE_BUFFER_OK


def _const_spec(block_shape, index_map):
    """BlockSpec for a grid-constant operand (weights / biases)."""
    if _single_buffer_supported():
        return pl.BlockSpec(block_shape, index_map, pipeline_mode=pl.Buffered(1))
    return pl.BlockSpec(block_shape, index_map)


# --------------------------------------------------------------------------- #
# Kernel 1: fused Q/K/V projections, written head-major (B, H, S, d_k).
# --------------------------------------------------------------------------- #
def _qkv_proj_kernel(xq_ref, xk_ref, xv_ref,
                     wq_ref, bq_ref, wk_ref, bk_ref, wv_ref, bv_ref,
                     qo_ref, ko_ref, vo_ref,
                     *, heads, d_k, scale, compute_dtype):
    rows = xq_ref.shape[1]

    def project(x_ref, w_ref, b_ref, s):
        # y = x @ W + b with f32 accumulation on the MXU (x, W may be bf16).
        y = jnp.dot(x_ref[0], w_ref[...],
                    preferred_element_type=jnp.float32) + b_ref[0]
        if s != 1.0:                      # fold 1/sqrt(d_k) into Q once
            y = y * s
        # (rows, D) -> (H, rows, d_k): done once here so the attention kernel
        # never has to relayout K/V per grid step.
        y = jnp.transpose(y.reshape(rows, heads, d_k), (1, 0, 2))
        return y.astype(compute_dtype)

    qo_ref[0] = project(xq_ref, wq_ref, bq_ref, scale)
    ko_ref[0] = project(xk_ref, wk_ref, bk_ref, 1.0)
    vo_ref[0] = project(xv_ref, wv_ref, bv_ref, 1.0)


# --------------------------------------------------------------------------- #
# Kernel 2: flash attention (online softmax) + fused output projection.
# --------------------------------------------------------------------------- #
def _flash_attn_kernel(q_ref, k_ref, v_ref, wo_ref, bo_ref, o_ref,
                       m_sc, l_sc, acc_sc, *, block_k, kv_resident):
    # q_ref:        (1, H, block_q, d_k)  -- resident across the kv sweep
    # k_ref/v_ref:  resident: (1, H, S, d_k) per batch, sliced with pl.ds
    #               streaming: (1, H, block_k, d_k) per kv step
    ki = pl.program_id(2)
    heads, tq, d_k = q_ref.shape[1], q_ref.shape[2], q_ref.shape[3]

    @pl.when(ki == 0)
    def _init():
        m_sc[...] = jnp.full_like(m_sc, -jnp.inf)
        l_sc[...] = jnp.zeros_like(l_sc)
        acc_sc[...] = jnp.zeros_like(acc_sc)

    q = q_ref[0]                                            # (H, tq, d_k)
    if kv_resident:
        start = pl.multiple_of(ki * block_k, block_k)
        kt = k_ref[0, :, pl.ds(start, block_k), :]          # (H, tk, d_k)
        vt = v_ref[0, :, pl.ds(start, block_k), :]
    else:
        kt = k_ref[0]
        vt = v_ref[0]

    # Head-batched scores (scale already folded into q), f32 accumulation.
    # d_k < MXU width is a model property; large tq/tk amortize MXU fill/drain.
    s = jnp.einsum("hqd,hkd->hqk", q, kt,
                   preferred_element_type=jnp.float32)      # (H, tq, tk)

    # Online softmax update (all f32); running stats kept 2-D (H, tq).
    m_prev = m_sc[...]
    m_new = jnp.maximum(m_prev, jnp.max(s, axis=-1))
    alpha = jnp.exp(m_prev - m_new)
    p = jnp.exp(s - m_new[:, :, None])                      # (H, tq, tk)
    l_sc[...] = alpha * l_sc[...] + jnp.sum(p, axis=-1)
    acc_sc[...] = alpha[:, :, None] * acc_sc[...] + jnp.einsum(
        "hqk,hkd->hqd", p.astype(vt.dtype), vt,
        preferred_element_type=jnp.float32)
    m_sc[...] = m_new

    # TODO(synk): dropout(p=0.5) on `p` in training mode; identity in eval.

    @pl.when(ki == pl.num_programs(2) - 1)
    def _finalize():
        inv = pl.reciprocal(l_sc[...], approx=True)[:, :, None]   # EUP, ~free
        ctx = acc_sc[...] * inv                                   # (H, tq, d_k)
        concat = jnp.transpose(ctx, (1, 0, 2)).reshape(tq, heads * d_k)
        out = jnp.dot(concat.astype(wo_ref.dtype), wo_ref[...],
                      preferred_element_type=jnp.float32) + bo_ref[0]
        o_ref[0] = out.astype(o_ref.dtype)                        # lane-dense D


# --------------------------------------------------------------------------- #
# Wrapper.
# --------------------------------------------------------------------------- #
def multi_head_attention(q, k, v, params, *, heads,
                         block_q=None, block_k=None, block_r=None,
                         compute_dtype=jnp.bfloat16,
                         kv_resident=None,
                         vmem_limit_bytes=None):
    """Multi-head attention forward (eval mode, mask=None).  q, k, v: (B, S, D).

    params = (wq, bq, wk, bk, wv, bv, wo, bo); weights stored (D_in, D_out).
    """
    B, S, D = q.shape
    assert k.shape == (B, S, D) and v.shape == (B, S, D)
    assert D % heads == 0, "d_model must be divisible by heads"
    d_k = D // heads
    out_dtype = q.dtype

    # Tile defaults.  v6e (128 MiB VMEM): block_q=256 / block_k up to 1024 with
    # vmem_limit_bytes ~64 MiB is profitable; v5e (16 MiB scoped default):
    # prefer block_k<=256 or pass vmem_limit_bytes; v7x (64 MiB): keep
    # block_k<=512 and rely on the streaming-KV fallback for long S.
    if block_r is None:
        block_r = min(S, 256)
    if block_q is None:
        block_q = min(S, 256)
    if block_k is None:
        block_k = min(S, 512)
    assert S % block_r == 0 and S % block_q == 0 and S % block_k == 0, \
        "S must be divisible by the chosen tiles"
    nr, nq, nk = S // block_r, S // block_q, S // block_k

    wq, bq, wk, bk, wv, bv, wo, bo = params

    # MXU operands (activations + weights) in the compute dtype (bf16 default):
    # full-rate MXU feed and halved HBM traffic.  Biases / softmax math stay f32.
    q_c, k_c, v_c = (x.astype(compute_dtype) for x in (q, k, v))
    wq_c, wk_c, wv_c, wo_c = (w.astype(compute_dtype) for w in (wq, wk, wv, wo))
    bq2, bk2, bv2, bo2 = (b.reshape(1, D).astype(jnp.float32)
                          for b in (bq, bk, bv, bo))

    if kv_resident is None:
        kv_resident = (2 * S * D * jnp.dtype(compute_dtype).itemsize
                       <= _KV_RESIDENT_BYTES)

    cp_extra = {}
    if vmem_limit_bytes is not None:
        cp_extra["vmem_limit_bytes"] = vmem_limit_bytes

    # ------------------- Kernel 1: Q/K/V projections ------------------------ #
    x_spec = pl.BlockSpec((1, block_r, D), lambda b, r: (b, r, 0))
    w_spec = _const_spec((D, D), lambda b, r: (0, 0))
    b_spec = _const_spec((1, D), lambda b, r: (0, 0))
    head_spec = pl.BlockSpec((1, heads, block_r, d_k), lambda b, r: (b, 0, r, 0))
    proj_shape = jax.ShapeDtypeStruct((B, heads, S, d_k), compute_dtype)

    proj_kernel = functools.partial(
        _qkv_proj_kernel, heads=heads, d_k=d_k,
        scale=1.0 / math.sqrt(d_k), compute_dtype=compute_dtype)

    qp, kp, vp = pl.pallas_call(
        proj_kernel,
        out_shape=(proj_shape, proj_shape, proj_shape),
        grid_spec=pltpu.PrefetchScalarGridSpec(
            num_scalar_prefetch=0,
            grid=(B, nr),
            in_specs=[x_spec, x_spec, x_spec,
                      w_spec, b_spec, w_spec, b_spec, w_spec, b_spec],
            out_specs=[head_spec, head_spec, head_spec]),
        compiler_params=pltpu.CompilerParams(
            dimension_semantics=("parallel", "parallel"), **cp_extra),
    )(q_c, k_c, v_c, wq_c, bq2, wk_c, bk2, wv_c, bv2)

    # ----------------- Kernel 2: flash attention + out-proj ----------------- #
    q_spec = pl.BlockSpec((1, heads, block_q, d_k),
                          lambda b, qi, ki: (b, 0, qi, 0))
    if kv_resident:
        # Block index depends only on b: one HBM->VMEM copy of K/V per batch,
        # reused for every (query tile, kv tile) step -> no nq-fold re-read.
        kv_spec = pl.BlockSpec((1, heads, S, d_k),
                               lambda b, qi, ki: (b, 0, 0, 0))
    else:
        # Streaming fallback for long sequences (v7x 64 MiB VMEM budget).
        kv_spec = pl.BlockSpec((1, heads, block_k, d_k),
                               lambda b, qi, ki: (b, 0, ki, 0))
    wo_spec = _const_spec((D, D), lambda b, qi, ki: (0, 0))
    bo_spec = _const_spec((1, D), lambda b, qi, ki: (0, 0))

    flash_kernel = functools.partial(
        _flash_attn_kernel, block_k=block_k, kv_resident=kv_resident)

    return pl.pallas_call(
        flash_kernel,
        out_shape=jax.ShapeDtypeStruct((B, S, D), out_dtype),
        grid_spec=pltpu.PrefetchScalarGridSpec(
            num_scalar_prefetch=0,
            grid=(B, nq, nk),
            in_specs=[q_spec, kv_spec, kv_spec, wo_spec, bo_spec],
            out_specs=pl.BlockSpec((1, block_q, D),
                                   lambda b, qi, ki: (b, qi, 0)),
            scratch_shapes=[
                pltpu.VMEM((heads, block_q), jnp.float32),       # running max
                pltpu.VMEM((heads, block_q), jnp.float32),       # running denom
                pltpu.VMEM((heads, block_q, d_k), jnp.float32),  # out accumulator
            ]),
        compiler_params=pltpu.CompilerParams(
            # batch & query tiles are independent (feed both v7x TensorCores);
            # the kv axis carries the online-softmax state.
            dimension_semantics=("parallel", "parallel", "arbitrary"),
            **cp_extra),
    )(qp, kp, vp, wo_c, bo2)


# --------------------------------------------------------------------------- #
# Pure-JAX reference mirroring the PyTorch forward (eval mode, mask=None).
# --------------------------------------------------------------------------- #
def _reference_mha(q, k, v, params, *, heads):
    B, S, D = q.shape
    d_k = D // heads
    wq, bq, wk, bk, wv, bv, wo, bo = params

    def lin(x, w, b):
        return x @ w + b

    qp = lin(q, wq, bq).reshape(B, S, heads, d_k).transpose(0, 2, 1, 3)
    kp = lin(k, wk, bk).reshape(B, S, heads, d_k).transpose(0, 2, 1, 3)
    vp = lin(v, wv, bv).reshape(B, S, heads, d_k).transpose(0, 2, 1, 3)

    scores = jnp.einsum("bhqd,bhkd->bhqk", qp, kp) / math.sqrt(d_k)
    probs = jax.nn.softmax(scores, axis=-1)
    out = jnp.einsum("bhqk,bhkd->bhqd", probs, vp)
    concat = out.transpose(0, 2, 1, 3).reshape(B, S, D)
    return lin(concat, wo, bo)


def _make_inputs(key, B, S, D):
    keys = jax.random.split(key, 11)
    wscale = 1.0 / math.sqrt(D)
    params = (
        jax.random.normal(keys[0], (D, D), jnp.float32) * wscale,
        jax.random.normal(keys[1], (D,), jnp.float32) * 0.01,
        jax.random.normal(keys[2], (D, D), jnp.float32) * wscale,
        jax.random.normal(keys[3], (D,), jnp.float32) * 0.01,
        jax.random.normal(keys[4], (D, D), jnp.float32) * wscale,
        jax.random.normal(keys[5], (D,), jnp.float32) * 0.01,
        jax.random.normal(keys[6], (D, D), jnp.float32) * wscale,
        jax.random.normal(keys[7], (D,), jnp.float32) * 0.01,
    )
    q = jax.random.normal(keys[8], (B, S, D), jnp.float32)
    k = jax.random.normal(keys[9], (B, S, D), jnp.float32)
    v = jax.random.normal(keys[10], (B, S, D), jnp.float32)
    return q, k, v, params


if __name__ == "__main__":
    # --- Small shapes consistent with the module: B=2, S=8, D=32, heads=4 ----
    B, S, D, H = 2, 8, 32, 4
    q, k, v, params = _make_inputs(jax.random.PRNGKey(0), B, S, D)
    ref = _reference_mha(q, k, v, params, heads=H)

    out_f32 = jax.block_until_ready(
        multi_head_attention(q, k, v, params, heads=H,
                             compute_dtype=jnp.float32))
    assert out_f32.shape == (B, S, D)
    assert jnp.allclose(out_f32, ref, atol=5e-3, rtol=5e-3), \
        "small f32 mismatch vs reference"

    out_bf16 = jax.block_until_ready(
        multi_head_attention(q, k, v, params, heads=H))
    assert out_bf16.shape == (B, S, D)
    assert jnp.allclose(out_bf16, ref, atol=5e-2, rtol=5e-2), \
        "small bf16 mismatch vs reference"

    # --- Tiled configuration: exercises real (8,128) tiling, multi-step online
    #     softmax, and both the resident-KV and streaming-KV paths. -----------
    B2, S2, D2, H2 = 2, 256, 128, 4
    q2, k2, v2, params2 = _make_inputs(jax.random.PRNGKey(1), B2, S2, D2)
    ref2 = _reference_mha(q2, k2, v2, params2, heads=H2)

    out_res = jax.block_until_ready(
        multi_head_attention(q2, k2, v2, params2, heads=H2,
                             compute_dtype=jnp.float32,
                             block_q=64, block_k=64, block_r=128,
                             kv_resident=True))
    assert jnp.allclose(out_res, ref2, atol=1e-2, rtol=1e-2), \
        "tiled resident-KV mismatch vs reference"

    out_str = jax.block_until_ready(
        multi_head_attention(q2, k2, v2, params2, heads=H2,
                             compute_dtype=jnp.float32,
                             block_q=64, block_k=64, block_r=128,
                             kv_resident=False))
    assert jnp.allclose(out_str, ref2, atol=1e-2, rtol=1e-2), \
        "tiled streaming-KV mismatch vs reference"

    print("KERNEL_OK")
</pallas_src>

<mosaic_0001>
module attributes {stable_mosaic.version = 11 : i64} {
  func.func @_probe_kernel(%arg0: i32, %arg1: memref<8x128xf32, #tpu.memory_space<vmem>>, %arg2: memref<8x128xf32, #tpu.memory_space<vmem>>) attributes {dimension_semantics = [#tpu.dimension_semantics<arbitrary>], iteration_bounds = array<i64: 2>, scalar_prefetch = 0 : i64, scratch_operands = 0 : i64, tpu.core_type = #tpu.core_type<tc>, window_params = [{pipeline_mode = #tpu.pipeline_mode<synchronous>, transform_indices = @transform_0, window_bounds = array<i64: 8, 128>}, {pipeline_mode = #tpu.pipeline_mode<synchronous>, transform_indices = @transform_1, window_bounds = array<i64: 8, 128>}]} {
    %c0 = arith.constant 0 : index
    %c0_0 = arith.constant 0 : index
    %0 = vector.load %arg1[%c0, %c0_0] : memref<8x128xf32, #tpu.memory_space<vmem>>, vector<8x128xf32>
    %cst = arith.constant 1.000000e+00 : f32
    %1 = vector.broadcast %cst : f32 to vector<8x128xf32>
    %2 = arith.addf %0, %1 : vector<8x128xf32>
    %c0_1 = arith.constant 0 : index
    %c0_2 = arith.constant 0 : index
    %3 = vector.load %arg2[%c0_1, %c0_2] : memref<8x128xf32, #tpu.memory_space<vmem>>, vector<8x128xf32>
    tpu.vector_store %arg2[%c0_1, %c0_2], %2 {strides = array<i32>} : memref<8x128xf32, #tpu.memory_space<vmem>>, vector<8x128xf32>,
    return
  }
  func.func @transform_0(%arg0: i32) -> (i32, i32) {
    %c0_i32 = arith.constant 0 : i32
    %c0_i32_0 = arith.constant 0 : i32
    %c0_i32_1 = arith.constant 0 : i32
    return %c0_i32, %c0_i32_0 : i32, i32
  }
  func.func @transform_1(%arg0: i32) -> (i32, i32) {
    %c0_i32 = arith.constant 0 : i32
    %c0_i32_0 = arith.constant 0 : i32
    %c0_i32_1 = arith.constant 0 : i32
    return %c0_i32, %c0_i32_0 : i32, i32
  }
}

module attributes {stable_mosaic.version = 11 : i64} {
  func.func @_qkv_proj_kernel(%arg0: i32, %arg1: i32, %arg2: memref<1x8x32xf32, #tpu.memory_space<vmem>>, %arg3: memref<1x8x32xf32, #tpu.memory_space<vmem>>, %arg4: memref<1x8x32xf32, #tpu.memory_space<vmem>>, %arg5: memref<32x32xf32, #tpu.memory_space<vmem>>, %arg6: memref<1x32xf32, #tpu.memory_space<vmem>>, %arg7: memref<32x32xf32, #tpu.memory_space<vmem>>, %arg8: memref<1x32xf32, #tpu.memory_space<vmem>>, %arg9: memref<32x32xf32, #tpu.memory_space<vmem>>, %arg10: memref<1x32xf32, #tpu.memory_space<vmem>>, %arg11: memref<1x4x8x8xf32, #tpu.memory_space<vmem>>, %arg12: memref<1x4x8x8xf32, #tpu.memory_space<vmem>>, %arg13: memref<1x4x8x8xf32, #tpu.memory_space<vmem>>) attributes {dimension_semantics = [#tpu.dimension_semantics<parallel>, #tpu.dimension_semantics<parallel>], iteration_bounds = array<i64: 2, 1>, scalar_prefetch = 0 : i64, scratch_operands = 0 : i64, tpu.core_type = #tpu.core_type<tc>, window_params = [{transform_indices = @transform_0, window_bounds = array<i64: 1, 8, 32>}, {transform_indices = @transform_1, window_bounds = array<i64: 1, 8, 32>}, {transform_indices = @transform_2, window_bounds = array<i64: 1, 8, 32>}, {pipeline_mode = #tpu.pipeline_mode<synchronous>, transform_indices = @transform_3, window_bounds = array<i64: 32, 32>}, {pipeline_mode = #tpu.pipeline_mode<synchronous>, transform_indices = @transform_4, window_bounds = array<i64: 1, 32>}, {pipeline_mode = #tpu.pipeline_mode<synchronous>, transform_indices = @transform_5, window_bounds = array<i64: 32, 32>}, {pipeline_mode = #tpu.pipeline_mode<synchronous>, transform_indices = @transform_6, window_bounds = array<i64: 1, 32>}, {pipeline_mode = #tpu.pipeline_mode<synchronous>, transform_indices = @transform_7, window_bounds = array<i64: 32, 32>}, {pipeline_mode = #tpu.pipeline_mode<synchronous>, transform_indices = @transform_8, window_bounds = array<i64: 1, 32>}, {transform_indices = @transform_9, window_bounds = array<i64: 1, 4, 8, 8>}, {transform_indices = @transform_10, window_bounds = array<i64: 1, 4, 8, 8>}, {transform_indices = @transform_11, window_bounds = array<i64: 1, 4, 8, 8>}]} {
    %c0 = arith.constant 0 : index
    %c0_0 = arith.constant 0 : index
    %c0_1 = arith.constant 0 : index
    %0 = vector.load %arg2[%c0, %c0_0, %c0_1] : memref<1x8x32xf32, #tpu.memory_space<vmem>>, vector<1x8x32xf32>
    %1 = vector.shape_cast %0 : vector<1x8x32xf32> to vector<8x32xf32>
    %c0_2 = arith.constant 0 : index
    %c0_3 = arith.constant 0 : index
    %2 = vector.load %arg5[%c0_2, %c0_3] : memref<32x32xf32, #tpu.memory_space<vmem>>, vector<32x32xf32>
    %cst = arith.constant dense<0.000000e+00> : vector<8x32xf32>
    %3 = tpu.matmul %1, %2, %cst {dimension_numbers = #tpu.dot_dimension_numbers<[1], [0], [0], [1], [0, 0, 1, 1], [], []>} : vector<8x32xf32>, vector<32x32xf32>, vector<8x32xf32> -> vector<8x32xf32>
    %c0_4 = arith.constant 0 : index
    %c0_5 = arith.constant 0 : index
    %4 = vector.load %arg6[%c0_4, %c0_5] : memref<1x32xf32, #tpu.memory_space<vmem>>, vector<1x32xf32>
    %5 = vector.shape_cast %4 : vector<1x32xf32> to vector<32xf32>
    %6 = vector.shape_cast %5 : vector<32xf32> to vector<1x32xf32>
    %7 = vector.broadcast %6 : vector<1x32xf32> to vector<8x32xf32>
    %8 = arith.addf %3, %7 : vector<8x32xf32>
    %cst_6 = arith.constant 0.353553385 : f32
    %9 = vector.broadcast %cst_6 : f32 to vector<8x32xf32>
    %10 = arith.mulf %8, %9 : vector<8x32xf32>
    %11 = vector.shape_cast %10 : vector<8x32xf32> to vector<8x4x8xf32>
    %12 = tpu.transpose %11, [1, 0, 2] : vector<8x4x8xf32> -> vector<4x8x8xf32>
    %c0_7 = arith.constant 0 : index
    %c0_8 = arith.constant 0 : index
    %c0_9 = arith.constant 0 : index
    %c0_10 = arith.constant 0 : index
    %13 = vector.load %arg11[%c0_7, %c0_8, %c0_9, %c0_10] : memref<1x4x8x8xf32, #tpu.memory_space<vmem>>, vector<1x4x8x8xf32>
    %14 = vector.shape_cast %13 : vector<1x4x8x8xf32> to vector<4x8x8xf32>
    %15 = vector.shape_cast %12 : vector<4x8x8xf32> to vector<1x4x8x8xf32>
    tpu.vector_store %arg11[%c0_7, %c0_8, %c0_9, %c0_10], %15 {strides = array<i32>} : memref<1x4x8x8xf32, #tpu.memory_space<vmem>>, vector<1x4x8x8xf32>,
    %c0_11 = arith.constant 0 : index
    %c0_12 = arith.constant 0 : index
    %c0_13 = arith.constant 0 : index
    %16 = vector.load %arg3[%c0_11, %c0_12, %c0_13] : memref<1x8x32xf32, #tpu.memory_space<vmem>>, vector<1x8x32xf32>
    %17 = vector.shape_cast %16 : vector<1x8x32xf32> to vector<8x32xf32>
    %c0_14 = arith.constant 0 : index
    %c0_15 = arith.constant 0 : index
    %18 = vector.load %arg7[%c0_14, %c0_15] : memref<32x32xf32, #tpu.memory_space<vmem>>, vector<32x32xf32>
    %cst_16 = arith.constant dense<0.000000e+00> : vector<8x32xf32>
    %19 = tpu.matmul %17, %18, %cst_16 {dimension_numbers = #tpu.dot_dimension_numbers<[1], [0], [0], [1], [0, 0, 1, 1], [], []>} : vector<8x32xf32>, vector<32x32xf32>, vector<8x32xf32> -> vector<8x32xf32>
    %c0_17 = arith.constant 0 : index
    %c0_18 = arith.constant 0 : index
    %20 = vector.load %arg8[%c0_17, %c0_18] : memref<1x32xf32, #tpu.memory_space<vmem>>, vector<1x32xf32>
    %21 = vector.shape_cast %20 : vector<1x32xf32> to vector<32xf32>
    %22 = vector.shape_cast %21 : vector<32xf32> to vector<1x32xf32>
    %23 = vector.broadcast %22 : vector<1x32xf32> to vector<8x32xf32>
    %24 = arith.addf %19, %23 : vector<8x32xf32>
    %25 = vector.shape_cast %24 : vector<8x32xf32> to vector<8x4x8xf32>
    %26 = tpu.transpose %25, [1, 0, 2] : vector<8x4x8xf32> -> vector<4x8x8xf32>
    %c0_19 = arith.constant 0 : index
    %c0_20 = arith.constant 0 : index
    %c0_21 = arith.constant 0 : index
    %c0_22 = arith.constant 0 : index
    %27 = vector.load %arg12[%c0_19, %c0_20, %c0_21, %c0_22] : memref<1x4x8x8xf32, #tpu.memory_space<vmem>>, vector<1x4x8x8xf32>
    %28 = vector.shape_cast %27 : vector<1x4x8x8xf32> to vector<4x8x8xf32>
    %29 = vector.shape_cast %26 : vector<4x8x8xf32> to vector<1x4x8x8xf32>
    tpu.vector_store %arg12[%c0_19, %c0_20, %c0_21, %c0_22], %29 {strides = array<i32>} : memref<1x4x8x8xf32, #tpu.memory_space<vmem>>, vector<1x4x8x8xf32>,
    %c0_23 = arith.constant 0 : index
    %c0_24 = arith.constant 0 : index
    %c0_25 = arith.constant 0 : index
    %30 = vector.load %arg4[%c0_23, %c0_24, %c0_25] : memref<1x8x32xf32, #tpu.memory_space<vmem>>, vector<1x8x32xf32>
    %31 = vector.shape_cast %30 : vector<1x8x32xf32> to vector<8x32xf32>
    %c0_26 = arith.constant 0 : index
    %c0_27 = arith.constant 0 : index
    %32 = vector.load %arg9[%c0_26, %c0_27] : memref<32x32xf32, #tpu.memory_space<vmem>>, vector<32x32xf32>
    %cst_28 = arith.constant dense<0.000000e+00> : vector<8x32xf32>
    %33 = tpu.matmul %31, %32, %cst_28 {dimension_numbers = #tpu.dot_dimension_numbers<[1], [0], [0], [1], [0, 0, 1, 1], [], []>} : vector<8x32xf32>, vector<32x32xf32>, vector<8x32xf32> -> vector<8x32xf32>
    %c0_29 = arith.constant 0 : index
    %c0_30 = arith.constant 0 : index
    %34 = vector.load %arg10[%c0_29, %c0_30] : memref<1x32xf32, #tpu.memory_space<vmem>>, vector<1x32xf32>
    %35 = vector.shape_cast %34 : vector<1x32xf32> to vector<32xf32>
    %36 = vector.shape_cast %35 : vector<32xf32> to vector<1x32xf32>
    %37 = vector.broadcast %36 : vector<1x32xf32> to vector<8x32xf32>
    %38 = arith.addf %33, %37 : vector<8x32xf32>
    %39 = vector.shape_cast %38 : vector<8x32xf32> to vector<8x4x8xf32>
    %40 = tpu.transpose %39, [1, 0, 2] : vector<8x4x8xf32> -> vector<4x8x8xf32>
    %c0_31 = arith.constant 0 : index
    %c0_32 = arith.constant 0 : index
    %c0_33 = arith.constant 0 : index
    %c0_34 = arith.constant 0 : index
    %41 = vector.load %arg13[%c0_31, %c0_32, %c0_33, %c0_34] : memref<1x4x8x8xf32, #tpu.memory_space<vmem>>, vector<1x4x8x8xf32>
    %42 = vector.shape_cast %41 : vector<1x4x8x8xf32> to vector<4x8x8xf32>
    %43 = vector.shape_cast %40 : vector<4x8x8xf32> to vector<1x4x8x8xf32>
    tpu.vector_store %arg13[%c0_31, %c0_32, %c0_33, %c0_34], %43 {strides = array<i32>} : memref<1x4x8x8xf32, #tpu.memory_space<vmem>>, vector<1x4x8x8xf32>,
    return
  }
  func.func @transform_0(%arg0: i32, %arg1: i32) -> (i32, i32, i32) {
    %c0_i32 = arith.constant 0 : i32
    %c0_i32_0 = arith.constant 0 : i32
    return %arg0, %arg1, %c0_i32 : i32, i32, i32
  }
  func.func @transform_1(%arg0: i32, %arg1: i32) -> (i32, i32, i32) {
    %c0_i32 = arith.constant 0 : i32
    %c0_i32_0 = arith.constant 0 : i32
    return %arg0, %arg1, %c0_i32 : i32, i32, i32
  }
  func.func @transform_2(%arg0: i32, %arg1: i32) -> (i32, i32, i32) {
    %c0_i32 = arith.constant 0 : i32
    %c0_i32_0 = arith.constant 0 : i32
    return %arg0, %arg1, %c0_i32 : i32, i32, i32
  }
  func.func @transform_3(%arg0: i32, %arg1: i32) -> (i32, i32) {
    %c0_i32 = arith.constant 0 : i32
    %c0_i32_0 = arith.constant 0 : i32
    %c0_i32_1 = arith.constant 0 : i32
    return %c0_i32, %c0_i32_0 : i32, i32
  }
  func.func @transform_4(%arg0: i32, %arg1: i32) -> (i32, i32) {
    %c0_i32 = arith.constant 0 : i32
    %c0_i32_0 = arith.constant 0 : i32
    %c0_i32_1 = arith.constant 0 : i32
    return %c0_i32, %c0_i32_0 : i32, i32
  }
  func.func @transform_5(%arg0: i32, %arg1: i32) -> (i32, i32) {
    %c0_i32 = arith.constant 0 : i32
    %c0_i32_0 = arith.constant 0 : i32
    %c0_i32_1 = arith.constant 0 : i32
    return %c0_i32, %c0_i32_0 : i32, i32
  }
  func.func @transform_6(%arg0: i32, %arg1: i32) -> (i32, i32) {
    %c0_i32 = arith.constant 0 : i32
    %c0_i32_0 = arith.constant 0 : i32
    %c0_i32_1 = arith.constant 0 : i32
    return %c0_i32, %c0_i32_0 : i32, i32
  }
  func.func @transform_7(%arg0: i32, %arg1: i32) -> (i32, i32) {
    %c0_i32 = arith.constant 0 : i32
    %c0_i32_0 = arith.constant 0 : i32
    %c0_i32_1 = arith.constant 0 : i32
    return %c0_i32, %c0_i32_0 : i32, i32
  }
  func.func @transform_8(%arg0: i32, %arg1: i32) -> (i32, i32) {
    %c0_i32 = arith.constant 0 : i32
    %c0_i32_0 = arith.constant 0 : i32
    %c0_i32_1 = arith.constant 0 : i32
    return %c0_i32, %c0_i32_0 : i32, i32
  }
  func.func @transform_9(%arg0: i32, %arg1: i32) -> (i32, i32, i32, i32) {
    %c0_i32 = arith.constant 0 : i32
    %c0_i32_0 = arith.constant 0 : i32
    %c0_i32_1 = arith.constant 0 : i32
    return %arg0, %c0_i32, %arg1, %c0_i32_0 : i32, i32, i32, i32
  }
  func.func @transform_10(%arg0: i32, %arg1: i32) -> (i32, i32, i32, i32) {
    %c0_i32 = arith.constant 0 : i32
    %c0_i32_0 = arith.constant 0 : i32
    %c0_i32_1 = arith.constant 0 : i32
    return %arg0, %c0_i32, %arg1, %c0_i32_0 : i32, i32, i32, i32
  }
  func.func @transform_11(%arg0: i32, %arg1: i32) -> (i32, i32, i32, i32) {
    %c0_i32 = arith.constant 0 : i32
    %c0_i32_0 = arith.constant 0 : i32
    %c0_i32_1 = arith.constant 0 : i32
    return %arg0, %c0_i32, %arg1, %c0_i32_0 : i32, i32, i32, i32
  }
}

</mosaic_0001>

<bundles_post_ra>
// kernel: tpu_custom_call.1
= control target key start
LH: loop header
LB: loop body
LE: loop exit
PB: predicated region body
PF: predicated region fallthrough
CT: control target
= control target key end

     0   :  { %6 = vsyncpa [#allocation3], 0  ;;  %s287_s0 = inlined_call_operand.hbm [shape: f32[8,128], index: 0, kind: input, shape index: {}]   ;;  %s288_s1 = inlined_call_operand.hbm [shape: f32[8,128], index: 1, kind: output, shape index: {}]  }
   0x1   :  { %7 = vsyncpa [#allocation4], 0  ;;  %s270_s6 = smov 0  }
   0x2 LB: > { %s149_s7 = sadd.s32 4294967295, %s256_s6   ;;  %p150_p0 = scmp.ge.s32.totalorder %s256_s6, 1  ;;  %s256_s6 = sphi %s270_s6, %s13_s6  }
   0x3   : > { %p60_p1 = scmp.lt.s32.totalorder %s256_s6, 3  ;;  %s72_s10 = sshll.u32 %s287_s0, 4  ;;  %s73_s10 = int_to_ptr.hbm [resolvable:$true] %s72_s10 }
   0x4   : > { %p170_p3 = scmp.eq.s32.totalorder %s149_s7, 0  ;;  %s258_s11 = smov [#allocation2]  }
   0x5   : > { %p61_p2 = pnand %p150_p0, %p60_p1  ;;  %s74_s12 = sshll.u32 %s258_s11, 4  ;;  %s75_s12 = int_to_ptr.vmem [resolvable:$true] %s74_s12 }
   0x7   : > { %p166_p4 = pneg %p61_p2  ;;  %87 = sbr.rel (%p61_p2) target bundleno = 20 (0x14), region = 24 }
   0x9   : > { %p167_p5 = pnand %p170_p3, %p166_p4 }
   0xb   : > { %169 = dma.hbm_to_vmem [thread:$0]  (!%p167_p5), %s73_s10, 128, %s75_s12, [#allocation3]  }
   0xc   : > { %247 = dma.done.wait (%p170_p3), [#allocation3], 128  }
   0xd   : > { %249 = vsyncadd (%p170_p3), [#allocation3], 4294967168  ;;  %s259_s13 = smov [#allocation5]   ;;  %s109_s17 = sshll.u32 %s288_s1, 4  ;;  %v98_v0 = vld [vmem:[#allocation2] sm:$0xff]  ;;  %s110_s17 = int_to_ptr.hbm [resolvable:$true] %s109_s17 }
   0xe   : > { %s107_s14 = sshll.u32 %s259_s13, 4  ;;  %p172_p6 = scmp.eq.s32.totalorder %s149_s7, 1  ;;  %v99_v1 = vadd.f32 1.0, %v98_v0  ;;  %s108_s14 = int_to_ptr.vmem [resolvable:$true] %s107_s14 }
  0x10   : > { %100 = vst [vmem:[#allocation5] sm:$0xff] %v99_v1 }
  0x11   : > { %163 = dma.vmem_to_hbm [thread:$0]  (%p172_p6), %s108_s14, 128, %s110_s17, [#allocation4]  }
  0x12   : > { %251 = dma.done.wait (%p172_p6), [#allocation4], 128  }
  0x13   : > { %253 = vsyncadd (%p172_p6), [#allocation4], 4294967168 }
  0x14 PF: > { %s13_s6 = sadd.s32 1, %s256_s6  }
  0x15   : > { %p10_p7 = scmp.ge.s32.totalorder %s13_s6, 4  }
  0x17   :  { %12 = sbr.rel (!%p10_p7) target bundleno = 2 (0x2), region = 53 }
  0x1c   :  { %123 = vsyncpa [#allocation3], 1 }
  0x1d   :  { %125 = vsyncpa [#allocation3 + $0x1], 1 }
  0x1e   :  { %126 = vsyncpa [#allocation4], 1 }
  0x1f   :  { %128 = vsyncpa [#allocation4 + $0x1], 1 }

// kernel: tpu_custom_call.1
= control target key start
LH: loop header
LB: loop body
LE: loop exit
PB: predicated region body
PF: predicated region fallthrough
CT: control target
= control target key end

     0   :  { %s2369_s0 = inlined_call_operand.hbm [shape: f32[2,8,32], index: 0, kind: input, shape index: {}]   ;;  %s2370_s1 = inlined_call_operand.hbm [shape: f32[2,8,32], index: 1, kind: input, shape index: {}]   ;;  %s2371_s2 = inlined_call_operand.hbm [shape: f32[2,8,32], index: 2, kind: input, shape index: {}]   ;;  %s2372_s3 = inlined_call_operand.hbm [shape: f32[32,32], index: 3, kind: input, shape index: {}]   ;;  %s2373_s4 = inlined_call_operand.vmem [shape: f32[1,32], index: 4, kind: input, shape index: {}]   ;;  %s2374_s5 = inlined_call_operand.hbm [shape: f32[32,32], index: 5, kind: input, shape index: {}]   ;;  %s2375_s6 = inlined_call_operand.vmem [shape: f32[1,32], index: 6, kind: input, shape index: {}]   ;;  %s2376_s7 = inlined_call_operand.hbm [shape: f32[32,32], index: 7, kind: input, shape index: {}]   ;;  %s2377_s8 = inlined_call_operand.vmem [shape: f32[1,32], index: 8, kind: input, shape index: {}]   ;;  %s2378_s9 = inlined_call_operand.hbm [shape: f32[2,4,8,8], index: 9, kind: output, shape index: {0}]   ;;  %s2379_s10 = inlined_call_operand.hbm [shape: f32[2,4,8,8], index: 10, kind: output, shape index: {1}]   ;;  %s2380_s11 = inlined_call_operand.hbm [shape: f32[2,4,8,8], index: 11, kind: output, shape index: {2}]  }
   0x1   :  { %2398 = sst [smem:[#allocation31_spill]] %s2370_s1 }
   0x2   :  { %2399 = sst [smem:[#allocation32_spill]] %s2372_s3 }
   0x3   :  { %2400 = sst [smem:[#allocation33_spill]] %s2374_s5 }
   0x4   :  { %2401 = sst [smem:[#allocation34_spill]] %s2376_s7 }
   0x5   :  { %2402 = sst [smem:[#allocation35_spill]] %s2378_s9 }
   0x6   :  { %2403 = sst [smem:[#allocation36_spill]] %s2379_s10 }
   0x7   :  { %2404 = sst [smem:[#allocation37_spill]] %s2380_s11 }
   0x8   :  { %17 = vsyncpa [#allocation3], 0 }
   0x9   :  { %19 = vsyncpa [#allocation3 + $0x1], 0 }
   0xa   :  { %20 = vsyncpa [#allocation6], 0 }
   0xb   :  { %22 = vsyncpa [#allocation6 + $0x1], 0 }
   0xc   :  { %23 = vsyncpa [#allocation9], 0 }
   0xd   :  { %24 = vsyncpa [#allocation12], 0 }
   0xe   :  { %25 = vsyncpa [#allocation4], 0 }
   0xf   :  { %27 = vsyncpa [#allocation4 + $0x1], 0 }
  0x10   :  { %28 = vsyncpa [#allocation15], 0 }
  0x11   :  { %30 = vsyncpa [#allocation15 + $0x1], 0  ;;  %s1907_s17 = smov 0   ;;  %s1909_s18 = smov 0  }
  0x12   :  { %s1911_s19 = smov 0   ;;  %s1913_s20 = smov 0  }
  0x13   :  { %s1915_s21 = smov 0   ;;  %s1917_s22 = smov 0  }
  0x14 LB: > { %2405 = sst [smem:[#allocation23_spill]] %s1813_s17  ;;  %s1938_s23 = sadd.s32 4294967295, %s1833_s22   ;;  %s1833_s22 = sphi %s1917_s22, %s36_s22   ;;  %s1829_s21 = sphi %s1915_s21, %s2438_s21   ;;  %s1825_s20 = sphi %s1913_s20, %s2437_s20   ;;  %s1821_s19 = sphi %s1911_s19, %s2441_s19   ;;  %s1817_s18 = sphi %s1909_s18, %s2440_s18   ;;  %s1813_s17 = sphi %s1907_s17, %s2439_s17  }
  0x15   : > { %2406 = sst [smem:[#allocation24_spill]] %s1825_s20  ;;  %p1336_p0 = scmp.ge.s32.totalorder %s1833_s22, 1 }
  0x16   : > { %2407 = sst [smem:[#allocation25_spill]] %s1829_s21  ;;  %p71_p1 = scmp.eq.s32.totalorder %s1938_s23, 0 }
  0x17   : > { %2408 = sst [smem:[#allocation26_spill]] %s1833_s22  ;;  %p347_p2 = scmp.lt.s32.totalorder %s1833_s22, 3 }
  0x18   : > { %s2409_s3 = sld [smem:[#allocation32_spill]]  ;;  %s1835_s28 = smov [#allocation8]  }
  0x19   : > { %p1946_p3 = pnand %p1336_p0, %p347_p2  ;;  %s360_s29 = sshll.u32 %s1835_s28, 4  ;;  %s361_s29 = int_to_ptr.vmem [resolvable:$true] %s360_s29 }
  0x1a   : > { %p1340_p6 = scmp.ge.s32.totalorder %s1833_s22, 2  ;;  %s2381_s12 = smov 128  }
  0x1b   : > { %p1398_p4 = pneg %p1946_p3  ;;  %s2383_s13 = smov 8  }
  0x1c   : > { %s2386_s14 = sadd.s32 4294967294, %s1833_s22   ;;  %s48_s15 = sadd.s32 1, %s1829_s21 }
  0x1d   : > { %p1954_p5 = pnand %p1398_p4, %p71_p1  ;;  %s57_s16 = sadd.s32 1, %s1821_s19 }
  0x1e   : > { %s358_s26 = sshll.u32 %s2409_s3, 4  ;;  %p50_p7 = scmp.ge.s32.totalorder %s48_s15, 2  ;;  %s359_s26 = int_to_ptr.hbm [resolvable:$true] %s358_s26 }
  0x1f   : > { %1401 = dma.hbm_to_vmem [thread:$0]  (!%p1954_p5), %s359_s26, 512, %s361_s29, [#allocation9], %s2381_s12, %s2381_s12, %s2383_s13  }
  0x20   : > { %p64_p8 = scmp.ne.s32.totalorder %s1821_s19, %s1817_s18  ;;  %p65_p9 = scmp.eq.s32.totalorder %s1833_s22, 0 }
  0x21   : > { %p70_p10 = scmp.ne.s32.totalorder %s1817_s18, %s1813_s17  ;;  %s2443_s15 = smov (%p50_p7, %s48_s15), 0 }
  0x22   : > { %2412 = sst [smem:[#allocation27_spill]] %s2443_s15  ;;  %p1974_p11 = por %p65_p9, %p64_p8 }
  0x23   : > { %p1980_p12 = por %p71_p1, %p70_p10  ;;  %s52_s26 = ssub.s32 %s1829_s21, %s2443_s15 }
  0x24   : > { %p278_p13 = scmp.eq.s32.totalorder %s1938_s23, 1  ;;  %p55_p0 = scmp.eq.s32.totalorder %s52_s26, 0 }
  0x25   : > { %p284_p2 = scmp.eq.s32.totalorder %s2386_s14, 1  ;;  %p1431_p7 = scmp.lt.s32.totalorder %s1833_s22, 2 }
  0x26   : > { %p1989_p4 = por %p278_p13, %p64_p8  ;;  %s2390_s13 = sand.u32 1, %s1821_s19  }
  0x27   : > { %s1995_s29 = scalar_select %p55_p0, %s1821_s19, %s57_s16  }
  0x28   : > { %s2415_s28 = scalar_select %p1989_p4, 1, 0 }
  0x29   : > { %2417 = sst [smem:[#allocation29_spill]] %s1995_s29  ;;  %p1997_p9 = por %p284_p2, %p70_p10 }
  0x2a   : > { %2416 = sst [smem:[#allocation28_spill]] %s2415_s28  ;;  %s2004_s3 = sshll.u32 %s2390_s13, 3 }
  0x2b   : > { %s2418_s12 = scalar_select %p1997_p9, 1, 0 }
  0x2c   : > { %s2007_s15 = sshll.u32 %s1829_s21, 3  ;;  %p2011_p8 = pnand %p1431_p7, %p1974_p11 }
  0x2d   : > { %2419 = sst [smem:[#allocation30_spill]] %s2418_s12  ;;  %s431_s16 = sand.u32 1, %s1833_s22  }
  0x2e   : > { %s2421_s1 = sld [smem:[#allocation31_spill]]  ;;  %s435_s9 = scalar_lea.vmem [#allocation5], %s2004_s3 }
  0x2f   : > { %s444_s13 = sshll.u32 %s435_s9, 4  ;;  %s2021_s24 = scalar_lea.sflag [#allocation6], %s431_s16  ;;  %s445_s13 = int_to_ptr.vmem [resolvable:$true] %s444_s13 }
  0x30   : > { %s2422_s5 = sld [smem:[#allocation33_spill]]  ;;  %s1838_s14 = smov [#allocation10]  }
  0x31   : > { %s2423_s7 = sld [smem:[#allocation34_spill]]  ;;  %s2424_s16 = smov 8  }
  0x32   : > { %s2425_s28 = smov 128   ;;  %s1839_s11 = smov [#allocation11]  }
  0x33   : > { %s415_s9 = scalar_lea.vmem [#allocation2], %s2004_s3  ;;  %s455_s10 = scalar_lea.vmem [#allocation7], %s2004_s3 }
  0x34   : > { %s440_s12 = scalar_lea.hbm %s2421_s1, %s2007_s15  ;;  %s424_s29 = sshll.u32 %s415_s9, 4  ;;  %s425_s29 = int_to_ptr.vmem [resolvable:$true] %s424_s29 }
  0x35   : > { %s442_s17 = sshll.u32 %s440_s12, 4  ;;  %s377_s12 = sshll.u32 %s1838_s14, 4  ;;  %s443_s17 = int_to_ptr.hbm [resolvable:$true] %s442_s17  ;;  %s378_s12 = int_to_ptr.vmem [resolvable:$true] %s377_s12 }
  0x36   : > { %1414 = dma.hbm_to_vmem [thread:$0]  (!%p2011_p8), %s443_s17, 128, %s445_s13, %s2021_s24  }
  0x37   : > { %s375_s22 = sshll.u32 %s2422_s5, 4  ;;  %s392_s1 = sshll.u32 %s2423_s7, 4  ;;  %s376_s22 = int_to_ptr.hbm [resolvable:$true] %s375_s22  ;;  %s393_s1 = int_to_ptr.hbm [resolvable:$true] %s392_s1 }
  0x38   : > { %1404 = dma.hbm_to_vmem [thread:$0]  (!%p1954_p5), %s376_s22, 512, %s378_s12, [#allocation9], %s2425_s28, %s2425_s28, %s2424_s16  }
  0x39   : > { %s394_s17 = sshll.u32 %s1839_s11, 4  ;;  %s420_s14 = scalar_lea.hbm %s2369_s0, %s2007_s15  ;;  %s395_s17 = int_to_ptr.vmem [resolvable:$true] %s394_s17 }
  0x3a   : > { %1407 = dma.hbm_to_vmem [thread:$0]  (!%p1954_p5), %s393_s1, 512, %s395_s17, [#allocation12], %s2425_s28, %s2425_s28, %s2424_s16  }
  0x3b   : > { %s422_s5 = sshll.u32 %s420_s14, 4  ;;  %s2426_s22 = sand.u32 1, %s1821_s19   ;;  %s423_s5 = int_to_ptr.hbm [resolvable:$true] %s422_s5 }
  0x3c   : > { %s412_s12 = scalar_lea.sflag [#allocation3], %s2426_s22  ;;  %s460_s7 = scalar_lea.hbm %s2371_s2, %s2007_s15 }
  0x3d   : > { %1411 = dma.hbm_to_vmem [thread:$0]  (!%p2011_p8), %s423_s5, 128, %s425_s29, %s412_s12  }
  0x3e   : > { %s464_s20 = sshll.u32 %s455_s10, 4  ;;  %s462_s1 = sshll.u32 %s460_s7, 4  ;;  %s465_s20 = int_to_ptr.vmem [resolvable:$true] %s464_s20  ;;  %s463_s1 = int_to_ptr.hbm [resolvable:$true] %s462_s1 }
  0x3f   : > { %1417 = dma.hbm_to_vmem [thread:$0]  (!%p2011_p8), %s463_s1, 128, %s465_s20, %s2021_s24  }
  0x40   : > { %473 = sbr.rel (%p1946_p3) target bundleno = 400 (0x190), region = 56  ;;  %s2062_s28 = sand.u32 (!%p1946_p3), 1, %s1817_s18  }
  0x41   : > { %s2065_s5 = sshll.u32 (!%p1946_p3), %s2062_s28, 3  ;;  %s476_s15 = scalar_lea.sflag (!%p1946_p3), [#allocation3], %s2062_s28 }
  0x42   : > { %s479_s3 = scalar_lea.vmem (!%p1946_p3), [#allocation2], %s2065_s5 }
  0x45   : > { %1788 = dma.done.wait (%p1980_p12), %s476_s15, 128  }
  0x46   : > { %1790 = vsyncadd (%p1980_p12), %s476_s15, 4294967168  ;;  %s485_s7 = sand.u32 1, %s1938_s23   ;;  %s489_s20 = scalar_lea.vmem [#allocation5], %s2065_s5 }
  0x47   : > { %s486_s10 = scalar_lea.sflag [#allocation6], %s485_s7 }
  0x48   : > { %1792 = dma.done.wait (%p1980_p12), %s486_s10, 256  }
  0x49   : > { %1794 = vsyncadd (%p1980_p12), %s486_s10, 4294967040  ;;  %s499_s27 = scalar_lea.vmem [#allocation7], %s2065_s5 }
  0x4a   : > { %1796 = dma.done.wait (%p71_p1), [#allocation9], 1024  }
  0x4b   : > { %1798 = vsyncadd (%p71_p1), [#allocation9], 4294966272 }
  0x4c   : > { %1800 = dma.done.wait (%p71_p1), [#allocation12], 512  }
  0x4d   : > { %1802 = vsyncadd (%p71_p1), [#allocation12], 4294966784  ;;  %v738_v0 = vld [vmem:[#allocation10 + $0x18] sm:$0xff]  ;;  %v737_v1 = vld [vmem:[#allocation10 + $0x10] sm:$0xff]  ;;  %vm583_vm0 = vcmask 261120   ;;  %s1840_s17 = smov 104  }
  0x4e   : > { %v894_v2 = vld [vmem:[#allocation11 + $0x18] sm:$0xff]  ;;  %758 = vmatpush.msra.mxu1 %v738_v0  ;;  %v893_v3 = vld [vmem:[#allocation11 + $0x10] sm:$0xff]  ;;  %v736_v5 = vld [vmem:[#allocation10 + $0x8] sm:$0xff]  ;;  %s1841_s21 = smov 120   ;;  %s1842_s9 = smov 112   ;;  %vm619_vm1 = vcmask 1047556  }
  0x4f   : > { %914 = vmatpush.msra.mxu2 %v894_v2  ;;  %v578_v4 = vld [vmem:[#allocation8 + $0x18] sm:$0xff]  ;;  %v892_v6 = vld [vmem:[#allocation11 + $0x8] sm:$0xff]  ;;  %v735_v7 = vld [vmem:[#allocation10] sm:$0xff]  ;;  %v1843_v26 = vmov 1983009808   ;;  %vm729_vm2 = vcmask 64512  }
  0x50   : > { %599 = vmatpush.msra.mxu0 %v578_v4  ;;  %759 = vmatpush.msra.mxu1 %v737_v1  ;;  %v577_v8 = vld [vmem:[#allocation8 + $0x10] sm:$0xff]  ;;  %v734_v9 = vld [vmem:[%s489_s20] sm:$0xff]  ;;  %v624_v27 = vunpack.c.l.s4 %v1843_v26  ;;  %v1844_v32 = vmov 1934713408   ;;  %s2427_s29 = sld [smem:[#allocation24_spill]]  ;;  %s2158_s12 = sshll.u32 %s2062_s28, 5 }
  0x51   : > { %915 = vmatpush.msra.mxu2 %v893_v3  ;;  %v891_v10 = vld [vmem:[#allocation11] sm:$0xff]  ;;  %v576_v11 = vld [vmem:[#allocation8 + $0x8] sm:$0xff]  ;;  %v890_v12 = vld [vmem:[%s499_s27] sm:$0xff]  ;;  %v648_v33 = vunpack.c.l.s4 %v1844_v32  ;;  %s2428_s1 = sld [smem:[#allocation36_spill]]  ;;  %s566_s15 = scalar_lea.vmem [#allocation14], %s2158_s12 }
  0x52   : > { %600 = vmatpush.msra.mxu0 %v577_v8  ;;  %760 = vmatpush.msra.mxu1 %v736_v5  ;;  %v575_v13 = vld [vmem:[#allocation8] sm:$0xff]  ;;  %v574_v14 = vld [vmem:[%s479_s3] sm:$0xff]  ;;  %v2108_v29 = vunpack.c.0.s8 %v624_v27  ;;  %s1088_s3 = sshll.u32 %s566_s15, 4  ;;  %s2211_s27 = scalar_lea.sflag [#allocation15], %s485_s7  ;;  %s2193_s3 = int_to_ptr.vmem [resolvable:$true] %s1088_s3 }
  0x53   : > { %916 = vmatpush.msra.mxu2 %v892_v6  ;;  %v1496_v15 = vld [vmem:[%s2375_s6] ss:$0 sm:$0xff]  ;;  %v2116_v45 = vunpack.c.0.s8 %v648_v33 }
  0x54   : > { %601 = vmatpush.msra.mxu0 %v576_v11  ;;  %761 = vmatpush.msra.mxu1 %v735_v7  ;;  %v1497_v16 = vld [vmem:[%s2373_s4] ss:$0 sm:$0xff] }
  0x55   : > { %917 = vmatpush.msra.mxu2 %v891_v10  ;;  %1358 = vmatmul.msk.f32.vlgmr.msra.gmra.mxu1 %vm583_vm0, %v734_v9  ;;  %v1498_v21 = vld [vmem:[%s2377_s8] ss:$0 sm:$0xff] }
  0x56   : > { %1359 = vmatmul.msk.f32.vlgmr.msra.gmra.mxu2 %vm583_vm0, %v890_v12  ;;  %602 = vmatpush.msra.mxu0 %v575_v13  ;;  %s2150_s22 = sshll.u32 %s2427_s29, 5 }
  0x57   : > { %1357 = vmatmul.msk.f32.vlgmr.msra.gmra.mxu0 %vm583_vm0, %v574_v14  ;;  %s1087_s5 = scalar_lea.hbm %s2428_s1, %s2150_s22 }
  0x58   : > { %s2181_s10 = sshll.u32 %s1087_s5, 4  ;;  %s1091_s10 = int_to_ptr.hbm [resolvable:$true] %s2181_s10 }
  0x59   : > { %s1693_s25 = sshra.s32 %s1091_s10, 4  ;;  %s1694_s25 = int_to_ptr.hbm [resolvable:$true] %s1693_s25 }
  0x5a   : > { %s1695_s26 = scalar_lea.hbm %s1694_s25, 32  ;;  %p1700_p10 = scmp.lt.s32.totalorder %s1694_s25, %s2428_s1 }
  0x5b   : > { %p1696_p1 = scmp.ne.s32.totalorder %s1694_s25, %s1695_s26 }
  0x5d   : > { %p1697_p3 = pnand %p1696_p1, %p1989_p4 }
  0x5f   : > { %p1698_p5 = pneg %p1697_p3 }
  0xd2   : > { %v763_v17 = vpop.f32.mrf.mxu1 }
  0xd3   : > { %v764_v18 = vadd.f32 %v1496_v15, %v763_v17 }
  0xd4   : > { %v604_v19 = vpop.f32.mrf.mxu0 }
  0xd5   : > { %773 = vrot.lane.b32.xlu2 %v764_v18, %s1840_s17  ;;  %767 = vrot.lane.b32.xlu1 %v764_v18, %s1841_s21  ;;  %v605_v20 = vadd.f32 %v1497_v16, %v604_v19  ;;  %v778_v34 = vrot.slane %v764_v18, 4 }
  0xd6   : > { %770 = vrot.lane.b32.xlu0 %v764_v18, %s1842_s9 }
  0xd7   : > { %v2101_v23 = vmul.f32 0.35355338, %v605_v20 }
  0xd9   : > { %v919_v22 = vpop.f32.mrf.mxu2  ;;  %v621_v59 = vrot.slane %v2101_v23, 4 }
  0xda   : > { %v920_v24 = vadd.f32 %v1498_v21, %v919_v22 }
  0xdc   : > { %v934_v54 = vrot.slane %v920_v24, 4 }
  0xdd   : > { %926 = vrot.lane.b32.xlu1 %v920_v24, %s1842_s9  ;;  %609 = vrot.lane.b32.xlu2 %v2101_v23, %s1841_s21 }
  0xde   : > { %612 = vrot.lane.b32.xlu0 %v2101_v23, %s1842_s9 }
  0xe5   : > { %923 = vrot.lane.b32.xlu1 %v920_v24, %s1841_s21  ;;  %929 = vrot.lane.b32.xlu2 %v920_v24, %s1840_s17 }
  0xe6   : > { %615 = vrot.lane.b32.xlu0 %v2101_v23, %s1840_s17  ;;  %s1699_s17 = scalar_lea.hbm %s2428_s1, 64 }
  0xe7   : > { %p1701_p11 = scmp.lt.s32.totalorder %s1699_s17, %s1695_s26 }
  0xe9   : > { %p1702_p12 = por %p1701_p11, %p1700_p10 }
  0xeb   : > { %p1703_p13 = pnand %p1702_p12, %p1698_p5 }
 0x12f   : > { %v774_v25 = vpop.permute.xlu2 %773 }
 0x130   : > { %v788_v30 = vrot.slane %v774_v25, 4 }
 0x137   : > { %v2106_v28 = vpop.permute.xlu2 %609 }
 0x138   : > { %v633_v1 = vrot.slane %v2106_v28, 4 }
 0x13f   : > { %v930_v50 = vpop.permute.xlu2 %929 }
 0x140   : > { %v944_v2 = vrot.slane %v930_v50, 4 }
 0x147   : > { %v768_v31 = vpop.permute.xlu1 %767 }
 0x148   : > { %v789_v35 = vsel %vm619_vm1, %v788_v30, %v768_v31  ;;  %v790_v36 = vrot.slane %v768_v31, 4  ;;  %v771_v37 = vpop.permute.xlu0 %770 }
 0x149   : > { %v795_v38 = vperm.slane %v789_v35, %v2108_v29  ;;  %v776_v39 = vrot.slane %v771_v37, 4  ;;  %v779_v40 = vsel %vm619_vm1, %v771_v37, %v778_v34 }
 0x14a   : > { %v791_v41 = vsel %vm619_vm1, %v774_v25, %v790_v36  ;;  %v787_v42 = vperm.slane %v779_v40, %v2108_v29 }
 0x14b   : > { %v799_v43 = vperm.slane %v791_v41, %v2108_v29  ;;  %v800_v44 = vrot.slane %v795_v38, 4  ;;  %v777_v46 = vsel %vm619_vm1, %v776_v39, %v764_v18 }
 0x14c   : > { %v783_v47 = vperm.slane %v777_v46, %v2108_v29  ;;  %v814_v48 = vrot.slane %v787_v42, 4 }
 0x14d   : > { %v812_v49 = vrot.slane %v799_v43, 4 }
 0x14e   : > { %v801_v51 = vsel %vm619_vm1, %v800_v44, %v783_v47  ;;  %v802_v52 = vrot.slane %v783_v47, 4  ;;  %v815_v53 = vsel %vm619_vm1, %v799_v43, %v814_v48 }
 0x14f   : > { %v807_v55 = vperm.slane %v801_v51, %v2116_v45  ;;  %v813_v56 = vsel %vm619_vm1, %v812_v49, %v787_v42  ;;  %v823_v57 = vperm.slane %v815_v53, %v2116_v45  ;;  %v927_v58 = vpop.permute.xlu1 %926 }
 0x150   : > { %v803_v60 = vsel %vm619_vm1, %v795_v38, %v802_v52  ;;  %v819_v61 = vperm.slane %v813_v56, %v2116_v45  ;;  %v932_v62 = vrot.slane %v927_v58, 4  ;;  %v935_v63 = vsel %vm619_vm1, %v927_v58, %v934_v54  ;;  %v613_v0 = vpop.permute.xlu0 %612 }
 0x151   : > { %v811_v3 = vperm.slane %v803_v60, %v2116_v45  ;;  %v830_v4 = vrot.slane %v823_v57, 4  ;;  %v824_v5 = vrot.slane %v807_v55, 4  ;;  %v618_v8 = vrot.slane %v613_v0, 4 }
 0x152   : > { %v828_v6 = vrot.slane %v819_v61, 4  ;;  %v933_v7 = vsel %vm619_vm1, %v932_v62, %v920_v24  ;;  %v943_v12 = vperm.slane %v935_v63, %v2108_v29  ;;  %v622_v20 = vsel %vm619_vm1, %v613_v0, %v621_v59 }
 0x153   : > { %v826_v9 = vrot.slane %v811_v3, 4  ;;  %v831_v10 = vsel %vm619_vm1, 0.0, %v830_v4  ;;  %v843_v11 = vsel %vm619_vm1, %v830_v4, %v819_v61  ;;  %v939_v16 = vperm.slane %v933_v7, %v2108_v29 }
 0x154   : > { %v829_v13 = vsel %vm619_vm1, 0.0, %v828_v6  ;;  %v847_v14 = vperm.slane %v843_v11, %v2108_v29  ;;  %v848_v15 = vrot.slane %v831_v10, 4  ;;  %v620_v19 = vsel %vm619_vm1, %v618_v8, %v2101_v23 }
 0x155   : > { %v827_v17 = vsel %vm619_vm1, 0.0, %v826_v9  ;;  %v832_v18 = vsel %vm619_vm1, %v826_v9, %v807_v55  ;;  %v825_v26 = vsel %vm619_vm1, 0.0, %v824_v5  ;;  %v958_v30 = vrot.slane %v939_v16, 4 }
 0x156   : > { %v836_v21 = vperm.slane %v832_v18, %v2108_v29  ;;  %v837_v22 = vrot.slane %v827_v17, 4  ;;  %v849_v24 = vsel %vm619_vm1, %v848_v15, %v829_v13  ;;  %v868_v25 = vrot.slane %v847_v14, 4 }
 0x157   : > { %v853_v27 = vperm.slane %v849_v24, %v2108_v29  ;;  %v970_v31 = vrot.slane %v943_v12, 4  ;;  %v924_v32 = vpop.permute.xlu1 %923  ;;  %v2155_v39 = vperm.slane %v620_v19, %v2108_v29  ;;  %v2162_v41 = vperm.slane %v622_v20, %v2108_v29 }
 0x158   : > { %v838_v33 = vsel %vm619_vm1, %v837_v22, %v825_v26  ;;  %v856_v34 = vrot.slane %v836_v21, 4  ;;  %v945_v23 = vsel %vm619_vm1, %v944_v2, %v924_v32  ;;  %v946_v35 = vrot.slane %v924_v32, 4  ;;  %v616_v61 = vpop.permute.xlu0 %615 }
 0x159   : > { %v842_v36 = vperm.slane %v838_v33, %v2108_v29  ;;  %v866_v37 = vrot.slane %v853_v27, 4  ;;  %v869_v38 = vsel %vm619_vm1, %v853_v27, %v868_v25  ;;  %v951_v43 = vperm.slane %v945_v23, %v2108_v29 }
 0x15a   : > { %v877_v40 = vperm.slane %v869_v38, %v2116_v45  ;;  %v947_v42 = vsel %vm619_vm1, %v930_v50, %v946_v35  ;;  %v631_v10 = vrot.slane %v616_v61, 4 }
 0x15b   : > { %v854_v44 = vrot.slane %v842_v36, 4  ;;  %v857_v46 = vsel %vm619_vm1, %v842_v36, %v856_v34  ;;  %v867_v47 = vsel %vm619_vm1, %v866_v37, %v847_v14  ;;  %v955_v48 = vperm.slane %v947_v42, %v2108_v29 }
 0x15c   : > { %v865_v49 = vperm.slane %v857_v46, %v2116_v45  ;;  %v873_v51 = vperm.slane %v867_v47, %v2116_v45  ;;  %v882_v52 = vrot.slane %v877_v40, 4  ;;  %v956_v50 = vrot.slane %v951_v43, 4 }
 0x15d   : > { %v855_v53 = vsel %vm619_vm1, %v854_v44, %v836_v21  ;;  %v959_v54 = vsel %vm619_vm1, %v951_v43, %v958_v30  ;;  %v968_v55 = vrot.slane %v955_v48, 4  ;;  %v971_v56 = vsel %vm619_vm1, %v955_v48, %v970_v31 }
 0x15e   : > { %v861_v57 = vperm.slane %v855_v53, %v2116_v45  ;;  %v878_v58 = vrot.slane %v873_v51, 4  ;;  %v883_v59 = vsel %vm619_vm1, %v882_v52, %v865_v49  ;;  %v884_v60 = vrot.slane %v865_v49, 4 }
 0x15f   : > { %v957_v62 = vsel %vm619_vm1, %v956_v50, %v939_v16  ;;  %v967_v63 = vperm.slane %v959_v54, %v2116_v45  ;;  %v969_v0 = vsel %vm619_vm1, %v968_v55, %v943_v12  ;;  %v979_v2 = vperm.slane %v971_v56, %v2116_v45  ;;  %888 = vst.msk [vmem:[%s566_s15 + $0x10] sm:$0xff] %vm729_vm2, %v883_v59 }
 0x160   : > { %v879_v3 = vsel %vm619_vm1, %v878_v58, %v861_v57  ;;  %v880_v4 = vrot.slane %v861_v57, 4  ;;  %v885_v5 = vsel %vm619_vm1, %v877_v40, %v884_v60  ;;  %v963_v6 = vperm.slane %v957_v62, %v2116_v45 }
 0x161   : > { %v975_v7 = vperm.slane %v969_v0, %v2116_v45  ;;  %v982_v8 = vrot.slane %v967_v63, 4  ;;  %v986_v9 = vrot.slane %v979_v2, 4  ;;  %886 = vst.msk [vmem:[%s566_s15] sm:$0xff] %vm729_vm2, %v879_v3  ;;  %v645_v12 = vrot.slane %v2155_v39, 4 }
 0x162   : > { %v881_v11 = vsel %vm619_vm1, %v873_v51, %v880_v4  ;;  %v980_v13 = vrot.slane %v963_v6, 4  ;;  %v634_v14 = vsel %vm619_vm1, %v616_v61, %v633_v1  ;;  %889 = vst.msk [vmem:[%s566_s15 + $0x18] sm:$0xff] %vm729_vm2, %v885_v5 }
 0x163   : > { %v983_v15 = vsel %vm619_vm1, 0.0, %v982_v8  ;;  %v984_v16 = vrot.slane %v975_v7, 4  ;;  %v987_v17 = vsel %vm619_vm1, 0.0, %v986_v9  ;;  %v988_v18 = vsel %vm619_vm1, %v982_v8, %v963_v6  ;;  %887 = vst.msk [vmem:[%s566_s15 + $0x8] sm:$0xff] %vm729_vm2, %v881_v11 }
 0x164   : > { %v981_v19 = vsel %vm619_vm1, 0.0, %v980_v13  ;;  %v992_v20 = vperm.slane %v988_v18, %v2108_v29  ;;  %v993_v21 = vrot.slane %v983_v15, 4  ;;  %v999_v22 = vsel %vm619_vm1, %v986_v9, %v975_v7 }
 0x165   : > { %1706 = shalt.err (!%p1703_p13)
}
 0x166   : > { %s1845_s23 = smov 128   ;;  %s1846_s7 = smov 8   ;;  %v985_v1 = vsel %vm619_vm1, 0.0, %v984_v16  ;;  %v1003_v24 = vperm.slane %v999_v22, %v2108_v29  ;;  %v1004_v25 = vrot.slane %v987_v17, 4  ;;  %v632_v26 = vsel %vm619_vm1, %v631_v10, %v2106_v28 }
 0x167   : > { %1393 = dma.vmem_to_hbm [thread:$0]  (%p1989_p4), %s2193_s3, 512, %s1091_s10, %s2211_s27, %s1845_s23, %s1845_s23, %s1846_s7   ;;  %v994_v27 = vsel %vm619_vm1, %v993_v21, %v981_v19  ;;  %v1012_v30 = vrot.slane %v992_v20, 4  ;;  %v638_v31 = vperm.slane %v632_v26, %v2108_v29  ;;  %v642_v32 = vperm.slane %v634_v14, %v2108_v29 }
 0x168   : > { %v657_v33 = vrot.slane %v2162_v41, 4  ;;  %v998_v34 = vperm.slane %v994_v27, %v2108_v29  ;;  %v1005_v23 = vsel %vm619_vm1, %v1004_v25, %v985_v1  ;;  %v1024_v35 = vrot.slane %v1003_v24, 4  ;;  %s2430_s29 = sld [smem:[#allocation37_spill]]  ;;  %s573_s5 = scalar_lea.vmem [#allocation16], %s2158_s12 }
 0x169   : > { %v1009_v36 = vperm.slane %v1005_v23, %v2108_v29  ;;  %v643_v37 = vrot.slane %v638_v31, 4  ;;  %v646_v28 = vsel %vm619_vm1, %v638_v31, %v645_v12  ;;  %v655_v38 = vrot.slane %v642_v32, 4  ;;  %s1106_s15 = sshll.u32 %s573_s5, 4  ;;  %s2277_s15 = int_to_ptr.vmem [resolvable:$true] %s1106_s15 }
 0x16a   : > { %v1010_v40 = vrot.slane %v998_v34, 4  ;;  %v1013_v42 = vsel %vm619_vm1, %v998_v34, %v1012_v30  ;;  %v654_v43 = vperm.slane %v646_v28, %v2116_v45  ;;  %v658_v44 = vsel %vm619_vm1, %v642_v32, %v657_v33 }
 0x16b   : > { %v1021_v46 = vperm.slane %v1013_v42, %v2116_v45  ;;  %v1022_v47 = vrot.slane %v1009_v36, 4  ;;  %v1025_v48 = vsel %vm619_vm1, %v1009_v36, %v1024_v35  ;;  %v644_v49 = vsel %vm619_vm1, %v643_v37, %v2155_v39 }
 0x16c   : > { %v1011_v51 = vsel %vm619_vm1, %v1010_v40, %v992_v20  ;;  %v1033_v52 = vperm.slane %v1025_v48, %v2116_v45  ;;  %v650_v50 = vperm.slane %v644_v49, %v2116_v45  ;;  %v656_v53 = vsel %vm619_vm1, %v655_v38, %v2162_v41 }
 0x16d   : > { %v1017_v54 = vperm.slane %v1011_v51, %v2116_v45  ;;  %v1023_v55 = vsel %vm619_vm1, %v1022_v47, %v1003_v24  ;;  %v1040_v56 = vrot.slane %v1021_v46, 4  ;;  %v662_v39 = vperm.slane %v656_v53, %v2116_v45 }
 0x16e   : > { %s1105_s30 = scalar_lea.hbm %s2430_s29, %s2150_s22  ;;  %v1029_v57 = vperm.slane %v1023_v55, %v2116_v45  ;;  %v1038_v58 = vrot.slane %v1033_v52, 4  ;;  %v666_v59 = vperm.slane %v658_v44, %v2116_v45  ;;  %v667_v60 = vrot.slane %v650_v50, 4  ;;  %s1727_s24 = scalar_lea.hbm %s2430_s29, 64 }
 0x16f   : > { %s2265_s11 = sshll.u32 %s1105_s30, 4  ;;  %v1036_v61 = vrot.slane %v1017_v54, 4  ;;  %v1041_v41 = vsel %vm619_vm1, %v1033_v52, %v1040_v56  ;;  %v669_v62 = vrot.slane %v654_v43, 4  ;;  %v671_v63 = vrot.slane %v662_v39, 4  ;;  %s1109_s11 = int_to_ptr.hbm [resolvable:$true] %s2265_s11 }
 0x170   : > { %v1034_v0 = vrot.slane %v1029_v57, 4  ;;  %v1039_v2 = vsel %vm619_vm1, %v1038_v58, %v1021_v46  ;;  %1045 = vst.msk [vmem:[%s573_s5 + $0x18] sm:$0xff] %vm729_vm2, %v1041_v41  ;;  %v668_v3 = vsel %vm619_vm1, 0.0, %v667_v60  ;;  %v673_v4 = vrot.slane %v666_v59, 4  ;;  %s1721_s3 = sshra.s32 %s1109_s11, 4  ;;  %s1722_s3 = int_to_ptr.hbm [resolvable:$true] %s1721_s3 }
 0x171   : > { %v1037_v5 = vsel %vm619_vm1, %v1029_v57, %v1036_v61  ;;  %1044 = vst.msk [vmem:[%s573_s5 + $0x10] sm:$0xff] %vm729_vm2, %v1039_v2  ;;  %v670_v6 = vsel %vm619_vm1, 0.0, %v669_v62  ;;  %v672_v7 = vsel %vm619_vm1, 0.0, %v671_v63  ;;  %v675_v8 = vsel %vm619_vm1, %v669_v62, %v650_v50  ;;  %s1723_s10 = scalar_lea.hbm %s1722_s3, 32  ;;  %p1728_p8 = scmp.lt.s32.totalorder %s1722_s3, %s2430_s29 }
 0x172   : > { %v1035_v9 = vsel %vm619_vm1, %v1034_v0, %v1017_v54  ;;  %1043 = vst.msk [vmem:[%s573_s5 + $0x8] sm:$0xff] %vm729_vm2, %v1037_v5  ;;  %v674_v10 = vsel %vm619_vm1, 0.0, %v673_v4  ;;  %v679_v11 = vperm.slane %v675_v8, %v2108_v29  ;;  %v680_v12 = vrot.slane %v670_v6, 4  ;;  %p1724_p0 = scmp.ne.s32.totalorder %s1722_s3, %s1723_s10  ;;  %p1729_p1 = scmp.lt.s32.totalorder %s1727_s24, %s1723_s10 }
 0x173   : > { %1042 = vst.msk [vmem:[%s573_s5] sm:$0xff] %vm729_vm2, %v1035_v9  ;;  %v686_v13 = vsel %vm619_vm1, %v673_v4, %v662_v39  ;;  %v691_v14 = vrot.slane %v674_v10, 4 }
 0x174   : > { %v681_v15 = vsel %vm619_vm1, %v680_v12, %v668_v3  ;;  %v690_v16 = vperm.slane %v686_v13, %v2108_v29  ;;  %v699_v17 = vrot.slane %v679_v11, 4  ;;  %p1725_p2 = pnand %p1724_p0, %p1989_p4  ;;  %p1730_p3 = por %p1729_p1, %p1728_p8 }
 0x176   : > { %p1726_p7 = pneg %p1725_p2 }
 0x178   : > { %p1731_p5 = pnand %p1730_p3, %p1726_p7 }
 0x17a   : > { %1734 = shalt.err (!%p1731_p5)
}
 0x17b   : > { %1394 = dma.vmem_to_hbm [thread:$0]  (%p1989_p4), %s2277_s15, 512, %s1109_s11, %s2211_s27, %s1845_s23, %s1845_s23, %s1846_s7   ;;  %v685_v18 = vperm.slane %v681_v15, %v2108_v29  ;;  %v692_v19 = vsel %vm619_vm1, %v691_v14, %v672_v7  ;;  %v711_v21 = vrot.slane %v690_v16, 4 }
 0x17c   : > { %v696_v20 = vperm.slane %v692_v19, %v2108_v29  ;;  %s2431_s14 = sld [smem:[#allocation35_spill]]  ;;  %s559_s9 = scalar_lea.vmem [#allocation13], %s2158_s12 }
 0x17d   : > { %v697_v22 = vrot.slane %v685_v18, 4  ;;  %v700_v1 = vsel %vm619_vm1, %v685_v18, %v699_v17  ;;  %s1070_s30 = sshll.u32 %s559_s9, 4  ;;  %s1071_s30 = int_to_ptr.vmem [resolvable:$true] %s1070_s30 }
 0x17e   : > { %v708_v24 = vperm.slane %v700_v1, %v2116_v45  ;;  %v709_v25 = vrot.slane %v696_v20, 4  ;;  %v712_v26 = vsel %vm619_vm1, %v696_v20, %v711_v21 }
 0x17f   : > { %v698_v27 = vsel %vm619_vm1, %v697_v22, %v679_v11  ;;  %v720_v30 = vperm.slane %v712_v26, %v2116_v45 }
 0x180   : > { %v704_v31 = vperm.slane %v698_v27, %v2116_v45  ;;  %v710_v29 = vsel %vm619_vm1, %v709_v25, %v690_v16  ;;  %v727_v32 = vrot.slane %v708_v24, 4 }
 0x181   : > { %v716_v33 = vperm.slane %v710_v29, %v2116_v45  ;;  %v725_v34 = vrot.slane %v720_v30, 4 }
 0x182   : > { %s1069_s27 = scalar_lea.hbm %s2431_s14, %s2150_s22  ;;  %v723_v23 = vrot.slane %v704_v31, 4  ;;  %v728_v35 = vsel %vm619_vm1, %v720_v30, %v727_v32  ;;  %s1047_s22 = scalar_lea.sflag [#allocation4], %s2062_s28 }
 0x183   : > { %s2319_s11 = sshll.u32 %s1069_s27, 4  ;;  %v721_v36 = vrot.slane %v716_v33, 4  ;;  %v726_v37 = vsel %vm619_vm1, %v725_v34, %v708_v24  ;;  %733 = vst.msk [vmem:[%s559_s9 + $0x18] sm:$0xff] %vm729_vm2, %v728_v35  ;;  %s1755_s10 = scalar_lea.hbm %s2431_s14, 64  ;;  %s1073_s11 = int_to_ptr.hbm [resolvable:$true] %s2319_s11 }
 0x184   : > { %v724_v28 = vsel %vm619_vm1, %v716_v33, %v723_v23  ;;  %732 = vst.msk [vmem:[%s559_s9 + $0x10] sm:$0xff] %vm729_vm2, %v726_v37  ;;  %s1749_s12 = sshra.s32 %s1073_s11, 4  ;;  %s1750_s12 = int_to_ptr.hbm [resolvable:$true] %s1749_s12 }
 0x185   : > { %v722_v45 = vsel %vm619_vm1, %v721_v36, %v704_v31  ;;  %731 = vst.msk [vmem:[%s559_s9 + $0x8] sm:$0xff] %vm729_vm2, %v724_v28  ;;  %s1751_s5 = scalar_lea.hbm %s1750_s12, 32  ;;  %p1756_p13 = scmp.lt.s32.totalorder %s1750_s12, %s2431_s14 }
 0x186   : > { %730 = vst.msk [vmem:[%s559_s9] sm:$0xff] %vm729_vm2, %v722_v45  ;;  %p1752_p10 = scmp.ne.s32.totalorder %s1750_s12, %s1751_s5  ;;  %p1757_p0 = scmp.lt.s32.totalorder %s1755_s10, %s1751_s5 }
 0x188   : > { %p1753_p11 = pnand %p1752_p10, %p1989_p4  ;;  %p1758_p2 = por %p1757_p0, %p1756_p13 }
 0x18a   : > { %p1754_p12 = pneg %p1753_p11 }
 0x18c   : > { %p1759_p7 = pnand %p1758_p2, %p1754_p12 }
 0x18e   : > { %1762 = shalt.err (!%p1759_p7)
}
 0x18f   : > { %1392 = dma.vmem_to_hbm [thread:$0]  (%p1989_p4), %s1071_s30, 512, %s1073_s11, %s1047_s22, %s1845_s23, %s1845_s23, %s1846_s7  }
 0x190 PF: > { %s2432_s28 = sld [smem:[#allocation23_spill]]  ;;  %p1419_p8 = pnand %p1340_p6, %p1997_p9 }
 0x191   : > { %s2434_s16 = sld [smem:[#allocation26_spill]] }
 0x192   : > { %p1420_p1 = pneg %p1419_p8 }
 0x196   : > { %s1123_s17 = sand.u32 1, %s2432_s28  }
 0x197   : > { %s1124_s21 = scalar_lea.sflag [#allocation4], %s1123_s17 }
 0x198   : > { %1804 = dma.done.wait (%p1420_p1), %s1124_s21, 512  }
 0x199   : > { %1806 = vsyncadd (%p1420_p1), %s1124_s21, 4294966784  ;;  %s2435_s13 = sadd.s32 4294967294, %s2434_s16  }
 0x19a   : > { %s1133_s27 = sand.u32 1, %s2435_s13  }
 0x19b   : > { %s1134_s20 = scalar_lea.sflag [#allocation15], %s1133_s27 }
 0x19c   : > { %1808 = dma.done.wait (%p1420_p1), %s1134_s20, 1024  }
 0x19d   : > { %1810 = vsyncadd (%p1420_p1), %s1134_s20, 4294966272  ;;  %s36_s22 = sadd.s32 1, %s2434_s16   ;;  %s2436_s23 = sld [smem:[#allocation29_spill]] }
 0x19e   : > { %p33_p4 = scmp.ge.s32.totalorder %s36_s22, 4   ;;  %s2437_s20 = sld [smem:[#allocation25_spill]] }
 0x19f   : > { %s2438_s21 = sld [smem:[#allocation27_spill]]  ;;  %s2439_s17 = smov %s1817_s18 }
 0x1a0   : > { %s2440_s18 = smov %s1821_s19  ;;  %35 = sbr.rel (!%p33_p4) target bundleno = 20 (0x14), region = 169 }
 0x1a3   : > { %s2441_s19 = smov %s2436_s23 }
 0x1a5   :  { %1150 = vsyncpa [#allocation3], 1 }
 0x1a6   :  { %1152 = vsyncpa [#allocation3 + $0x1], 1 }
 0x1a7   :  { %1153 = vsyncpa [#allocation6], 1 }
 0x1a8   :  { %1155 = vsyncpa [#allocation6 + $0x1], 1 }
 0x1a9   :  { %1156 = vsyncpa [#allocation9], 1 }
 0x1aa   :  { %1157 = vsyncpa [#allocation12], 1 }
 0x1ab   :  { %1158 = vsyncpa [#allocation4], 1 }
 0x1ac   :  { %1160 = vsyncpa [#allocation4 + $0x1], 1 }
 0x1ad   :  { %1161 = vsyncpa [#allocation15], 1 }
 0x1ae   :  { %1163 = vsyncpa [#allocation15 + $0x1], 1 }

</bundles_post_ra>
